<compile_context>
chip_gen: v7x
topology: tpu7x:2x2x1
jax: 0.10.0
libtpu: 0.0.40
codegen_flags: <defaults>
</compile_context>

<pallas_src>
import functools
import math

import jax
import jax.numpy as jnp
from jax import lax
from jax.experimental import pallas as pl
from jax.experimental.pallas import tpu as pltpu


def _round_up(a, m):
    return -(-a // m) * m


def _dqn_kernel(x_ref, w1_ref, b1_ref, w2_ref, b2_ref, w3_ref, b3_ref,
                q_ref, act_ref, *, n_actions):
    # ---- Layer 1 on the VPU: K = n_states is tiny (2); an MXU matmul would just
    #      burn a weight push + result drain on the serial critical path. ----
    x = x_ref[...].astype(jnp.float32)            # [bB, n_states]
    w1 = w1_ref[...].astype(jnp.float32)          # [n_states, 128]
    h1 = b1_ref[...].astype(jnp.float32)          # [1, 128] -> broadcasts over bB
    for i in range(w1.shape[0]):                  # static unroll (n_states small)
        h1 = h1 + x[:, i:i + 1] * w1[i:i + 1, :]
    h1 = jnp.maximum(h1, 0.0)                     # [bB, 128]

    # ---- Layer 2 (MXU), f32 accumulation ----
    h2 = jnp.dot(h1.astype(w2_ref.dtype), w2_ref[...],
                 preferred_element_type=jnp.float32)
    h2 = jnp.maximum(h2 + b2_ref[...].astype(jnp.float32), 0.0)

    # ---- Layer 3 (MXU) straight into the narrow [bB, n_actions] output ----
    q = jnp.dot(h2.astype(w3_ref.dtype), w3_ref[...],
                preferred_element_type=jnp.float32)
    q = q + b3_ref[...].astype(jnp.float32)       # [bB, n_actions]
    q_ref[...] = q.astype(q_ref.dtype)

    # ---- Fused greedy action: first-max index (matches jnp.argmax), computed in
    #      otherwise-free VPU/XLU slots so the acting path avoids a 2nd dispatch. ----
    bB = q.shape[0]
    lane = lax.broadcasted_iota(jnp.int32, (bB, n_actions), 1)
    m = jnp.max(q, axis=-1, keepdims=True)
    idx = jnp.where(q == m, lane, n_actions)
    act_ref[...] = jnp.min(idx, axis=-1, keepdims=True).astype(jnp.int32)
    # TODO(synk): for training, fuse the Q[a] gather / TD-error here instead of
    # returning the full Q block when only selected-action values are needed.


def prepare_params(params, compute_dtype=jnp.float32):
    """One-time (init / target-net sync) preprocessing: bias reshape + dtype cast.

    bf16 compute is beneficial on ALL TPU generations (v5e/v6e/v7x MXUs are
    natively bf16); accumulation and biases stay f32 regardless.
    """
    w1, b1, w2, b2, w3, b3 = params
    return (w1.astype(compute_dtype), jnp.reshape(b1, (1, -1)).astype(jnp.float32),
            w2.astype(compute_dtype), jnp.reshape(b2, (1, -1)).astype(jnp.float32),
            w3.astype(compute_dtype), jnp.reshape(b3, (1, -1)).astype(jnp.float32))


def dqn_forward(x, prepared_params, *, block_b=512, return_actions=False):
    """Forward pass. Returns Q-values [B, n_actions] (and greedy actions [B] if asked).

    `prepared_params` must come from prepare_params() (done once, not per step).
    """
    w1, b1, w2, b2, w3, b3 = prepared_params
    B, n_states = x.shape
    n_actions = w3.shape[1]

    # Batch blocking: pad to sublane multiples of 8; for replay-sized batches
    # (>= 256 rows) use at least 2 blocks so v7x's two TensorCores both get work,
    # with bb capped at block_b (default 512) to amortize per-grid-step overhead.
    b_pad = _round_up(max(B, 8), 8)
    if b_pad >= 256:
        bb = max(8, min(block_b, (b_pad // 2) // 8 * 8))
        nb = -(-b_pad // bb)
        b_pad = nb * bb
    else:
        bb, nb = b_pad, 1

    xc = x.astype(w1.dtype)
    if b_pad != B:
        xc = jnp.zeros((b_pad, n_states), w1.dtype).at[:B].set(xc)

    kernel = functools.partial(_dqn_kernel, n_actions=n_actions)
    const = lambda a: pl.BlockSpec(a.shape, lambda i: (0, 0))  # weights VMEM-resident

    q_out, act_out = pl.pallas_call(
        kernel,
        out_shape=(jax.ShapeDtypeStruct((b_pad, n_actions), jnp.float32),
                   jax.ShapeDtypeStruct((b_pad, 1), jnp.int32)),
        grid=(nb,),
        in_specs=[
            pl.BlockSpec((bb, n_states), lambda i: (i, 0)),
            const(w1), const(b1),
            const(w2), const(b2),
            const(w3), const(b3),
        ],
        out_specs=(pl.BlockSpec((bb, n_actions), lambda i: (i, 0)),
                   pl.BlockSpec((bb, 1), lambda i: (i, 0))),
        compiler_params=pltpu.CompilerParams(
            dimension_semantics=("parallel",)),   # batch blocks shard across TCs
    )(xc, w1, b1, w2, b2, w3, b3)

    q = q_out if b_pad == B else q_out[:B]
    if return_actions:
        act = act_out[:, 0] if b_pad == B else act_out[:B, 0]
        return q, act
    return q


def init_params(key, n_states, n_actions, hidden=128):
    """Deterministic init matching PyTorch nn.Linear default (uniform +/- 1/sqrt(fan_in))."""
    def linear(key, fan_in, fan_out):
        kw, kb = jax.random.split(key)
        bound = 1.0 / math.sqrt(fan_in)
        w = jax.random.uniform(kw, (fan_in, fan_out), jnp.float32, -bound, bound)
        b = jax.random.uniform(kb, (1, fan_out), jnp.float32, -bound, bound)
        return w, b

    k1, k2, k3 = jax.random.split(key, 3)
    w1, b1 = linear(k1, n_states, hidden)
    w2, b2 = linear(k2, hidden, hidden)
    w3, b3 = linear(k3, hidden, n_actions)
    return (w1, b1, w2, b2, w3, b3)


def dqn_ref(x, params):
    w1, b1, w2, b2, w3, b3 = params
    h1 = jnp.maximum(x @ w1 + b1, 0.0)
    h2 = jnp.maximum(h1 @ w2 + b2, 0.0)
    return h2 @ w3 + b3


if __name__ == "__main__":
    n_states, n_actions = 2, 3   # MountainCar-v0: obs dim 2, 3 discrete actions

    key = jax.random.PRNGKey(0)
    kx, kp = jax.random.split(key)
    params = init_params(kp, n_states, n_actions)

    # One-time param prep (hot path never re-pads / re-casts weights).
    prepared_f32 = prepare_params(params, jnp.float32)
    prepared_bf16 = prepare_params(params, jnp.bfloat16)

    # Replay-minibatch-sized batch: b_pad=256 splits into 2x128 blocks so both
    # v7x TensorCores get work. f32 path (exact parity with the PyTorch module).
    B = 256
    x = jax.random.normal(kx, (B, n_states), jnp.float32)
    q, act = dqn_forward(x, prepared_f32, return_actions=True)
    q = jax.block_until_ready(q)
    ref = dqn_ref(x, params)
    assert q.shape == (B, n_actions)
    assert jnp.allclose(q, ref, atol=5e-3, rtol=5e-3)
    # Fused argmax must agree exactly with argmax over the kernel's own Q-values.
    assert jnp.array_equal(act, jnp.argmax(q, axis=-1))

    # Small, non-multiple-of-8 batch exercises the padding path (acting path).
    x2 = jax.random.normal(jax.random.PRNGKey(1), (5, n_states), jnp.float32)
    q2, act2 = dqn_forward(x2, prepared_f32, return_actions=True)
    q2 = jax.block_until_ready(q2)
    assert q2.shape == (5, n_actions) and act2.shape == (5,)
    assert jnp.allclose(q2, dqn_ref(x2, params), atol=5e-3, rtol=5e-3)
    assert jnp.array_equal(act2, jnp.argmax(q2, axis=-1))

    # bf16 compute path (native MXU dtype on v5e/v6e/v7x), f32 accumulation.
    # Note: input observations are also quantized to bf16 on this path.
    q3 = jax.block_until_ready(dqn_forward(x, prepared_bf16))
    assert jnp.allclose(q3, ref, atol=5e-2, rtol=5e-2)

    print("KERNEL_OK")
</pallas_src>

<mosaic_0001>
module attributes {stable_mosaic.version = 11 : i64} {
  func.func @_dqn_kernel(%arg0: i32, %arg1: memref<128x2xf32, #tpu.memory_space<vmem>>, %arg2: memref<2x128xf32, #tpu.memory_space<vmem>>, %arg3: memref<1x128xf32, #tpu.memory_space<vmem>>, %arg4: memref<128x128xf32, #tpu.memory_space<vmem>>, %arg5: memref<1x128xf32, #tpu.memory_space<vmem>>, %arg6: memref<128x3xf32, #tpu.memory_space<vmem>>, %arg7: memref<1x3xf32, #tpu.memory_space<vmem>>, %arg8: memref<128x3xf32, #tpu.memory_space<vmem>>, %arg9: memref<128x1xi32, #tpu.memory_space<vmem>>) attributes {dimension_semantics = [#tpu.dimension_semantics<parallel>], iteration_bounds = array<i64: 2>, scalar_prefetch = 0 : i64, scratch_operands = 0 : i64, tpu.core_type = #tpu.core_type<tc>, window_params = [{transform_indices = @transform_0, window_bounds = array<i64: 128, 2>}, {pipeline_mode = #tpu.pipeline_mode<synchronous>, transform_indices = @transform_1, window_bounds = array<i64: 2, 128>}, {pipeline_mode = #tpu.pipeline_mode<synchronous>, transform_indices = @transform_2, window_bounds = array<i64: 1, 128>}, {pipeline_mode = #tpu.pipeline_mode<synchronous>, transform_indices = @transform_3, window_bounds = array<i64: 128, 128>}, {pipeline_mode = #tpu.pipeline_mode<synchronous>, transform_indices = @transform_4, window_bounds = array<i64: 1, 128>}, {pipeline_mode = #tpu.pipeline_mode<synchronous>, transform_indices = @transform_5, window_bounds = array<i64: 128, 3>}, {pipeline_mode = #tpu.pipeline_mode<synchronous>, transform_indices = @transform_6, window_bounds = array<i64: 1, 3>}, {transform_indices = @transform_7, window_bounds = array<i64: 128, 3>}, {transform_indices = @transform_8, window_bounds = array<i64: 128, 1>}]} {
    %c0 = arith.constant 0 : index
    %c0_0 = arith.constant 0 : index
    %0 = vector.load %arg1[%c0, %c0_0] : memref<128x2xf32, #tpu.memory_space<vmem>>, vector<128x2xf32>
    %c0_1 = arith.constant 0 : index
    %c0_2 = arith.constant 0 : index
    %1 = vector.load %arg2[%c0_1, %c0_2] : memref<2x128xf32, #tpu.memory_space<vmem>>, vector<2x128xf32>
    %c0_3 = arith.constant 0 : index
    %c0_4 = arith.constant 0 : index
    %2 = vector.load %arg3[%c0_3, %c0_4] : memref<1x128xf32, #tpu.memory_space<vmem>>, vector<1x128xf32>
    %3 = vector.extract_strided_slice %0 {offsets = [0, 0], sizes = [128, 1], strides = [1, 1]} : vector<128x2xf32> to vector<128x1xf32>
    %4 = vector.extract_strided_slice %1 {offsets = [0, 0], sizes = [1, 128], strides = [1, 1]} : vector<2x128xf32> to vector<1x128xf32>
    %5 = vector.broadcast %3 : vector<128x1xf32> to vector<128x128xf32>
    %6 = vector.broadcast %4 : vector<1x128xf32> to vector<128x128xf32>
    %7 = arith.mulf %5, %6 : vector<128x128xf32>
    %8 = vector.broadcast %2 : vector<1x128xf32> to vector<128x128xf32>
    %9 = arith.addf %8, %7 : vector<128x128xf32>
    %10 = vector.extract_strided_slice %0 {offsets = [0, 1], sizes = [128, 1], strides = [1, 1]} : vector<128x2xf32> to vector<128x1xf32>
    %11 = vector.extract_strided_slice %1 {offsets = [1, 0], sizes = [1, 128], strides = [1, 1]} : vector<2x128xf32> to vector<1x128xf32>
    %12 = vector.broadcast %10 : vector<128x1xf32> to vector<128x128xf32>
    %13 = vector.broadcast %11 : vector<1x128xf32> to vector<128x128xf32>
    %14 = arith.mulf %12, %13 : vector<128x128xf32>
    %15 = arith.addf %9, %14 : vector<128x128xf32>
    %cst = arith.constant 0.000000e+00 : f32
    %16 = vector.broadcast %cst : f32 to vector<128x128xf32>
    %17 = arith.maximumf %15, %16 : vector<128x128xf32>
    %c0_5 = arith.constant 0 : index
    %c0_6 = arith.constant 0 : index
    %18 = vector.load %arg4[%c0_5, %c0_6] : memref<128x128xf32, #tpu.memory_space<vmem>>, vector<128x128xf32>
    %cst_7 = arith.constant dense<0.000000e+00> : vector<128x128xf32>
    %19 = tpu.matmul %17, %18, %cst_7 {dimension_numbers = #tpu.dot_dimension_numbers<[1], [0], [0], [1], [0, 0, 1, 1], [], []>} : vector<128x128xf32>, vector<128x128xf32>, vector<128x128xf32> -> vector<128x128xf32>
    %c0_8 = arith.constant 0 : index
    %c0_9 = arith.constant 0 : index
    %20 = vector.load %arg5[%c0_8, %c0_9] : memref<1x128xf32, #tpu.memory_space<vmem>>, vector<1x128xf32>
    %21 = vector.broadcast %20 : vector<1x128xf32> to vector<128x128xf32>
    %22 = arith.addf %19, %21 : vector<128x128xf32>
    %cst_10 = arith.constant 0.000000e+00 : f32
    %23 = vector.broadcast %cst_10 : f32 to vector<128x128xf32>
    %24 = arith.maximumf %22, %23 : vector<128x128xf32>
    %c0_11 = arith.constant 0 : index
    %c0_12 = arith.constant 0 : index
    %25 = vector.load %arg6[%c0_11, %c0_12] : memref<128x3xf32, #tpu.memory_space<vmem>>, vector<128x3xf32>
    %cst_13 = arith.constant dense<0.000000e+00> : vector<128x3xf32>
    %26 = tpu.matmul %24, %25, %cst_13 {dimension_numbers = #tpu.dot_dimension_numbers<[1], [0], [0], [1], [0, 0, 1, 1], [], []>} : vector<128x128xf32>, vector<128x3xf32>, vector<128x3xf32> -> vector<128x3xf32>
    %c0_14 = arith.constant 0 : index
    %c0_15 = arith.constant 0 : index
    %27 = vector.load %arg7[%c0_14, %c0_15] : memref<1x3xf32, #tpu.memory_space<vmem>>, vector<1x3xf32>
    %28 = vector.broadcast %27 : vector<1x3xf32> to vector<128x3xf32>
    %29 = arith.addf %26, %28 : vector<128x3xf32>
    %c0_16 = arith.constant 0 : index
    %c0_17 = arith.constant 0 : index
    %30 = vector.load %arg8[%c0_16, %c0_17] : memref<128x3xf32, #tpu.memory_space<vmem>>, vector<128x3xf32>
    tpu.vector_store %arg8[%c0_16, %c0_17], %29 {strides = array<i32>} : memref<128x3xf32, #tpu.memory_space<vmem>>, vector<128x3xf32>,
    %31 = tpu.iota {dimensions = array<i32: 1>} : vector<128x3xi32>
    %cst_18 = arith.constant dense<0xFF800000> : vector<128xf32>
    %32 = vector.multi_reduction <maximumf>, %29, %cst_18 [1] : vector<128x3xf32> to vector<128xf32>
    %33 = vector.shape_cast %32 : vector<128xf32> to vector<128x1xf32>
    %34 = vector.broadcast %33 : vector<128x1xf32> to vector<128x3xf32>
    %35 = arith.cmpf oeq, %29, %34 : vector<128x3xf32>
    %c3_i32 = arith.constant 3 : i32
    %36 = vector.broadcast %c3_i32 : i32 to vector<128x3xi32>
    %37 = arith.select %35, %31, %36 : vector<128x3xi1>, vector<128x3xi32>
    %cst_19 = arith.constant dense<2147483647> : vector<128xi32>
    %38 = vector.multi_reduction <minsi>, %37, %cst_19 [1] : vector<128x3xi32> to vector<128xi32>
    %39 = vector.shape_cast %38 : vector<128xi32> to vector<128x1xi32>
    %c0_20 = arith.constant 0 : index
    %c0_21 = arith.constant 0 : index
    %40 = vector.load %arg9[%c0_20, %c0_21] : memref<128x1xi32, #tpu.memory_space<vmem>>, vector<128x1xi32>
    tpu.vector_store %arg9[%c0_20, %c0_21], %39 {strides = array<i32>} : memref<128x1xi32, #tpu.memory_space<vmem>>, vector<128x1xi32>,
    return
  }
  func.func @transform_0(%arg0: i32) -> (i32, i32) {
    %c0_i32 = arith.constant 0 : i32
    %c0_i32_0 = arith.constant 0 : i32
    return %arg0, %c0_i32 : i32, i32
  }
  func.func @transform_1(%arg0: i32) -> (i32, i32) {
    %c0_i32 = arith.constant 0 : i32
    %c0_i32_0 = arith.constant 0 : i32
    %c0_i32_1 = arith.constant 0 : i32
    return %c0_i32, %c0_i32_0 : i32, i32
  }
  func.func @transform_2(%arg0: i32) -> (i32, i32) {
    %c0_i32 = arith.constant 0 : i32
    %c0_i32_0 = arith.constant 0 : i32
    %c0_i32_1 = arith.constant 0 : i32
    return %c0_i32, %c0_i32_0 : i32, i32
  }
  func.func @transform_3(%arg0: i32) -> (i32, i32) {
    %c0_i32 = arith.constant 0 : i32
    %c0_i32_0 = arith.constant 0 : i32
    %c0_i32_1 = arith.constant 0 : i32
    return %c0_i32, %c0_i32_0 : i32, i32
  }
  func.func @transform_4(%arg0: i32) -> (i32, i32) {
    %c0_i32 = arith.constant 0 : i32
    %c0_i32_0 = arith.constant 0 : i32
    %c0_i32_1 = arith.constant 0 : i32
    return %c0_i32, %c0_i32_0 : i32, i32
  }
  func.func @transform_5(%arg0: i32) -> (i32, i32) {
    %c0_i32 = arith.constant 0 : i32
    %c0_i32_0 = arith.constant 0 : i32
    %c0_i32_1 = arith.constant 0 : i32
    return %c0_i32, %c0_i32_0 : i32, i32
  }
  func.func @transform_6(%arg0: i32) -> (i32, i32) {
    %c0_i32 = arith.constant 0 : i32
    %c0_i32_0 = arith.constant 0 : i32
    %c0_i32_1 = arith.constant 0 : i32
    return %c0_i32, %c0_i32_0 : i32, i32
  }
  func.func @transform_7(%arg0: i32) -> (i32, i32) {
    %c0_i32 = arith.constant 0 : i32
    %c0_i32_0 = arith.constant 0 : i32
    return %arg0, %c0_i32 : i32, i32
  }
  func.func @transform_8(%arg0: i32) -> (i32, i32) {
    %c0_i32 = arith.constant 0 : i32
    %c0_i32_0 = arith.constant 0 : i32
    return %arg0, %c0_i32 : i32, i32
  }
}

</mosaic_0001>

<bundles_post_ra>
// kernel: tpu_custom_call.1
= control target key start
LH: loop header
LB: loop body
LE: loop exit
PB: predicated region body
PF: predicated region fallthrough
CT: control target
= control target key end

     0   :  { %s1716_s27 = smov 0   ;;  %s2352_s0 = inlined_call_operand.vmem [shape: f32[256,2], index: 0, kind: input, shape index: {}]   ;;  %s2353_s1 = inlined_call_operand.vmem [shape: f32[2,128], index: 1, kind: input, shape index: {}]   ;;  %s2354_s2 = inlined_call_operand.vmem [shape: f32[1,128], index: 2, kind: input, shape index: {}]   ;;  %s2355_s3 = inlined_call_operand.vmem [shape: f32[128,128], index: 3, kind: input, shape index: {}]   ;;  %s2356_s4 = inlined_call_operand.vmem [shape: f32[1,128], index: 4, kind: input, shape index: {}]   ;;  %s2357_s5 = inlined_call_operand.vmem [shape: f32[128,3], index: 5, kind: input, shape index: {}]   ;;  %s2358_s6 = inlined_call_operand.vmem [shape: f32[1,3], index: 6, kind: input, shape index: {}]   ;;  %s2359_s7 = inlined_call_operand.vmem [shape: f32[256,3], index: 7, kind: output, shape index: {0}]   ;;  %s2360_s8 = inlined_call_operand.vmem [shape: s32[256,1], index: 8, kind: output, shape index: {1}]  }
   0x1 LB: > { %s1377_s28 = sadd.s32 4294967295, %s1667_s27   ;;  %p1381_p0 = scmp.ge.s32.totalorder %s1667_s27, 1  ;;  %s1667_s27 = sphi %s1716_s27, %s19_s27  }
   0x2   : > { %p266_p1 = scmp.lt.s32.totalorder %s1667_s27, 3 }
   0x4   : > { %p267_p2 = pnand %p1381_p0, %p266_p1 }
   0x5   : > { %s1382_s29 = sshll.u32 (!%p267_p2), %s1377_s28, 4  ;;  %v579_v0 = vld [vmem:[%s2355_s3] sm:$0xff] (!%p267_p2)  ;;  %v580_v1 = vld [vmem:[%s2355_s3 + $0x8] sm:$0xff] (!%p267_p2)  ;;  %v581_v2 = vld [vmem:[%s2355_s3 + $0x10] sm:$0xff] (!%p267_p2)  ;;  %v1669_v3 = vmov (!%p267_p2), 1   ;;  %v1670_v22 = vmov (!%p267_p2), 0   ;;  %v421_v63 = vlaneseq (!%p267_p2) }
   0x6   : > { %270 = sbr.rel (%p267_p2) target bundleno = 1111 (0x457), region = 48  ;;  %1645 = vset.pattern.permute.xlu0 (!%p267_p2), %v1669_v3  ;;  %1643 = vset.pattern.permute.xlu1 (!%p267_p2), %v1669_v3  ;;  %p306_p3 = scmp.lt.s32.totalorder (!%p267_p2), %s1382_s29, 31  ;;  %v1569_v4 = vpack.c.bf16 (!%p267_p2), %v580_v1, %v579_v0  ;;  %v582_v5 = vld [vmem:[%s2355_s3 + $0x18] sm:$0xff] (!%p267_p2)  ;;  %v583_v7 = vld [vmem:[%s2355_s3 + $0x20] sm:$0xff] (!%p267_p2)  ;;  %v584_v8 = vld [vmem:[%s2355_s3 + $0x28] sm:$0xff] (!%p267_p2)  ;;  %vm931_vm0 = vcmask (!%p267_p2), 23552  }
   0x7   : > { %v1573_v6 = vpack.c.bf16 (!%p267_p2), %v582_v5, %v581_v2  ;;  %v1577_v11 = vpack.c.bf16 (!%p267_p2), %v584_v8, %v583_v7  ;;  %v585_v14 = vld [vmem:[%s2355_s3 + $0x30] sm:$0xff] (!%p267_p2)  ;;  %v586_v15 = vld [vmem:[%s2355_s3 + $0x38] sm:$0xff] (!%p267_p2)  ;;  %v587_v19 = vld [vmem:[%s2355_s3 + $0x40] sm:$0xff] (!%p267_p2)  ;;  %v422_v2 = vshrl.u32 (!%p267_p2), %v421_v63, 7 }
   0x8   : > { %1570 = vmatprep.subr.bf16.mxu0 (!%p267_p2), %v1569_v4  ;;  %v1581_v17 = vpack.c.bf16 (!%p267_p2), %v586_v15, %v585_v14  ;;  %v588_v20 = vld [vmem:[%s2355_s3 + $0x48] sm:$0xff] (!%p267_p2)  ;;  %v589_v23 = vld [vmem:[%s2355_s3 + $0x50] sm:$0xff] (!%p267_p2)  ;;  %v590_v24 = vld [vmem:[%s2355_s3 + $0x58] sm:$0xff] (!%p267_p2) }
   0x9   : > { %1572 = vmatpush3.bf16.msra.mxu0 (!%p267_p2), %v1569_v4  ;;  %v1585_v21 = vpack.c.bf16 (!%p267_p2), %v588_v20, %v587_v19  ;;  %v1589_v25 = vpack.c.bf16 (!%p267_p2), %v590_v24, %v589_v23  ;;  %v591_v26 = vld [vmem:[%s2355_s3 + $0x60] sm:$0xff] (!%p267_p2)  ;;  %v592_v27 = vld [vmem:[%s2355_s3 + $0x68] sm:$0xff] (!%p267_p2)  ;;  %v593_v30 = vld [vmem:[%s2355_s3 + $0x70] sm:$0xff] (!%p267_p2)  ;;  %v529_v5 = vsub.s32 (!%p267_p2), 1, %v422_v2  ;;  %v423_v7 = vsub.s32 (!%p267_p2), 0, %v422_v2 }
   0xa   : > { %1574 = vmatprep.subr.bf16.mxu0 (!%p267_p2), %v1573_v6  ;;  %v1593_v28 = vpack.c.bf16 (!%p267_p2), %v592_v27, %v591_v26  ;;  %v594_v31 = vld [vmem:[%s2355_s3 + $0x78] sm:$0xff] (!%p267_p2)  ;;  %v763_v42 = vld [vmem:[%s2357_s5] sm:$0xff] (!%p267_p2)  ;;  %v764_v43 = vld [vmem:[%s2357_s5 + $0x8] sm:$0xff] (!%p267_p2) }
   0xb   : > { %v1597_v32 = vpack.c.bf16 (!%p267_p2), %v594_v31, %v593_v30  ;;  %v765_v44 = vld [vmem:[%s2357_s5 + $0x10] sm:$0xff] (!%p267_p2)  ;;  %v1601_v45 = vpack.c.bf16 (!%p267_p2), %v764_v43, %v763_v42  ;;  %v766_v46 = vld [vmem:[%s2357_s5 + $0x18] sm:$0xff] (!%p267_p2)  ;;  %v767_v48 = vld [vmem:[%s2357_s5 + $0x20] sm:$0xff] (!%p267_p2) }
   0xc   : > { %v1605_v47 = vpack.c.bf16 (!%p267_p2), %v766_v46, %v765_v44  ;;  %v768_v49 = vld [vmem:[%s2357_s5 + $0x28] sm:$0xff] (!%p267_p2)  ;;  %v769_v51 = vld [vmem:[%s2357_s5 + $0x30] sm:$0xff] (!%p267_p2)  ;;  %v770_v52 = vld [vmem:[%s2357_s5 + $0x38] sm:$0xff] (!%p267_p2) }
   0xd   : > { %s2362_s29 = smov (!%p306_p3, %s1382_s29), 31  ;;  %1576 = vmatpush3.bf16.msra.mxu0 %v1573_v6  ;;  %1602 = vmatprep.subr.bf16.mxu1 %v1601_v45  ;;  %v1609_v50 = vpack.c.bf16 %v768_v49, %v767_v48  ;;  %v1613_v53 = vpack.c.bf16 %v770_v52, %v769_v51  ;;  %v771_v54 = vld [vmem:[%s2357_s5 + $0x40] sm:$0xff]  ;;  %v772_v55 = vld [vmem:[%s2357_s5 + $0x48] sm:$0xff]  ;;  %v773_v57 = vld [vmem:[%s2357_s5 + $0x50] sm:$0xff] }
   0xe   : > { %s1738_s16 = sshll.u32 %s2362_s29, 3  ;;  %1578 = vmatprep.subr.bf16.mxu0 %v1577_v11  ;;  %1604 = vmatpush3.bf16.msra.mxu1 %v1601_v45  ;;  %v1617_v56 = vpack.c.bf16 %v772_v55, %v771_v54  ;;  %v774_v58 = vld [vmem:[%s2357_s5 + $0x58] sm:$0xff]  ;;  %v775_v60 = vld [vmem:[%s2357_s5 + $0x60] sm:$0xff]  ;;  %v776_v61 = vld [vmem:[%s2357_s5 + $0x68] sm:$0xff] }
   0xf   : > { %s1744_s19 = scalar_lea.vmem %s2352_s0, %s1738_s16  ;;  %1606 = vmatprep.subr.bf16.mxu1 %v1605_v47  ;;  %v1621_v59 = vpack.c.bf16 %v774_v58, %v773_v57  ;;  %v1625_v62 = vpack.c.bf16 %v776_v61, %v775_v60  ;;  %v339_v8 = vld [vmem:[%s2353_s1] sm:$0x3]  ;;  %s1938_s28 = scalar_lea.vmem %s2359_s7, %s1738_s16 }
  0x10   : > { %v325_v9 = vld [vmem:[%s1744_s19 + $0x10] sm:$0xff]  ;;  %v323_v10 = vld [vmem:[%s1744_s19] sm:$0xff]  ;;  %v324_v13 = vld [vmem:[%s1744_s19 + $0x8] sm:$0xff]  ;;  %s2301_s9 = scalar_lea.vmem %s2360_s8, %s1738_s16 }
  0x11   : > { %472 = vperm.xlu0 %1645, %v325_v9   ;;  %464 = vperm.xlu1 %1643, %v323_v10   ;;  %v329_v12 = vld [vmem:[%s1744_s19 + $0x30] sm:$0xff]  ;;  %v326_v18 = vld [vmem:[%s1744_s19 + $0x18] sm:$0xff]  ;;  %v327_v29 = vld [vmem:[%s1744_s19 + $0x20] sm:$0xff] }
  0x12   : > { %v333_v16 = vld [vmem:[%s1744_s19 + $0x50] sm:$0xff]  ;;  %1580 = vmatpush3.bf16.msra.mxu0 %v1577_v11  ;;  %v328_v33 = vld [vmem:[%s1744_s19 + $0x28] sm:$0xff]  ;;  %v330_v35 = vld [vmem:[%s1744_s19 + $0x38] sm:$0xff]  ;;  %1608 = vmatpush3.bf16.msra.mxu1 %v1605_v47  ;;  %v1864_v11 = vrot.slane %v339_v8, %v423_v7 }
  0x13   : > { %1582 = vmatprep.subr.bf16.mxu0 %v1581_v17  ;;  %v332_v34 = vld [vmem:[%s1744_s19 + $0x48] sm:$0xff]  ;;  %v331_v37 = vld [vmem:[%s1744_s19 + $0x40] sm:$0xff]  ;;  %v337_v38 = vld [vmem:[%s1744_s19 + $0x70] sm:$0xff]  ;;  %1610 = vmatprep.subr.bf16.mxu1 %v1609_v50 }
  0x14   : > { %v336_v36 = vld [vmem:[%s1744_s19 + $0x68] sm:$0xff]  ;;  %v334_v39 = vld [vmem:[%s1744_s19 + $0x58] sm:$0xff]  ;;  %v335_v40 = vld [vmem:[%s1744_s19 + $0x60] sm:$0xff] }
  0x15   : > { %488 = vperm.xlu0 %1645, %v329_v12   ;;  %468 = vperm.xlu1 %1643, %v324_v13   ;;  %v338_v41 = vld [vmem:[%s1744_s19 + $0x78] sm:$0xff]  ;;  %v1870_v15 = vld [vmem:[%s2354_s2] ss:$0 sm:$0xff] }
  0x16   : > { %1584 = vmatpush3.bf16.msra.mxu0 %v1581_v17  ;;  %1612 = vmatpush3.bf16.msra.mxu1 %v1609_v50 }
  0x17   : > { %1586 = vmatprep.subr.bf16.mxu0 %v1585_v21  ;;  %1614 = vmatprep.subr.bf16.mxu1 %v1613_v53 }
  0x19   : > { %504 = vperm.xlu0 %1645, %v333_v16   ;;  %1644 = vset.pattern.permute.xlu1 %v1670_v22 }
  0x1a   : > { %358 = vperm.xlu1 %1644, %v326_v18   ;;  %1588 = vmatpush3.bf16.msra.mxu0 %v1585_v21 }
  0x1b   : > { %1590 = vmatprep.subr.bf16.mxu0 %v1589_v25  ;;  %1616 = vmatpush3.bf16.msra.mxu1 %v1613_v53 }
  0x1c   : > { %1618 = vmatprep.subr.bf16.mxu1 %v1617_v56 }
  0x1d   : > { %1654 = vset.pattern.permute.xlu0 %v1670_v22 }
  0x1e   : > { %343 = vperm.xlu0 %1654, %v323_v10   ;;  %1646 = vset.pattern.permute.xlu1 %v1669_v3  ;;  %v1862_v10 = vrot.slane %v339_v8, %v529_v5 }
  0x1f   : > { %476 = vperm.xlu1 %1646, %v326_v18   ;;  %1592 = vmatpush3.bf16.msra.mxu0 %v1589_v25 }
  0x20   : > { %1594 = vmatprep.subr.bf16.mxu0 %v1593_v28  ;;  %1620 = vmatpush3.bf16.msra.mxu1 %v1617_v56 }
  0x21   : > { %1622 = vmatprep.subr.bf16.mxu1 %v1621_v59 }
  0x22   : > { %348 = vperm.xlu0 %1654, %v324_v13  }
  0x23   : > { %1647 = vset.pattern.permute.xlu1 %v1670_v22  ;;  %1596 = vmatpush3.bf16.msra.mxu0 %v1593_v28 }
  0x24   : > { %363 = vperm.xlu1 %1647, %v327_v29   ;;  %1598 = vmatprep.subr.bf16.mxu0 %v1597_v32 }
  0x25   : > { %1624 = vmatpush3.bf16.msra.mxu1 %v1621_v59 }
  0x26   : > { %353 = vperm.xlu0 %1654, %v325_v9   ;;  %1626 = vmatprep.subr.bf16.mxu1 %v1625_v62 }
  0x27   : > { %1600 = vmatpush3.bf16.msra.mxu0 %v1597_v32 }
  0x28   : > { %1648 = vset.pattern.permute.xlu1 %v1669_v3 }
  0x29   : > { %480 = vperm.xlu1 %1648, %v327_v29   ;;  %1628 = vmatpush3.bf16.msra.mxu1 %v1625_v62 }
  0x2a   : > { %368 = vperm.xlu0 %1654, %v328_v33  }
  0x2d   : > { %484 = vperm.xlu1 %1648, %v328_v33  }
  0x2e   : > { %373 = vperm.xlu0 %1654, %v329_v12  }
  0x31   : > { %1649 = vset.pattern.permute.xlu1 %v1670_v22 }
  0x32   : > { %388 = vperm.xlu0 %1654, %v332_v34   ;;  %378 = vperm.xlu1 %1649, %v330_v35  }
  0x36   : > { %393 = vperm.xlu0 %1654, %v333_v16   ;;  %1650 = vset.pattern.permute.xlu1 %v1669_v3 }
  0x37   : > { %492 = vperm.xlu1 %1650, %v330_v35  }
  0x3a   : > { %408 = vperm.xlu0 %1654, %v336_v36  }
  0x3b   : > { %1651 = vset.pattern.permute.xlu1 %v1670_v22 }
  0x3c   : > { %383 = vperm.xlu1 %1651, %v331_v37  }
  0x3e   : > { %413 = vperm.xlu0 %1654, %v337_v38  }
  0x40   : > { %1652 = vset.pattern.permute.xlu1 %v1669_v3 }
  0x41   : > { %496 = vperm.xlu1 %1652, %v331_v37  }
  0x42   : > { %1659 = vset.pattern.permute.xlu0 %v1669_v3 }
  0x43   : > { %520 = vperm.xlu0 %1659, %v337_v38  }
  0x45   : > { %500 = vperm.xlu1 %1652, %v332_v34  }
  0x49   : > { %1653 = vset.pattern.permute.xlu1 %v1670_v22 }
  0x4a   : > { %398 = vperm.xlu1 %1653, %v334_v39  }
  0x4e   : > { %1655 = vset.pattern.permute.xlu1 %v1669_v3 }
  0x4f   : > { %508 = vperm.xlu1 %1655, %v334_v39  }
  0x53   : > { %1656 = vset.pattern.permute.xlu1 %v1670_v22 }
  0x54   : > { %403 = vperm.xlu1 %1656, %v335_v40  }
  0x58   : > { %1657 = vset.pattern.permute.xlu1 %v1669_v3 }
  0x59   : > { %512 = vperm.xlu1 %1657, %v335_v40  }
  0x5d   : > { %516 = vperm.xlu1 %1657, %v336_v36  }
  0x61   : > { %1658 = vset.pattern.permute.xlu1 %v1670_v22 }
  0x62   : > { %418 = vperm.xlu1 %1658, %v338_v41  }
  0x66   : > { %1660 = vset.pattern.permute.xlu1 %v1669_v3 }
  0x67   : > { %524 = vperm.xlu1 %1660, %v338_v41  }
  0x90   : > { %v465_v0 = vpop.permute.xlu1 %464  ;;  %v473_v1 = vpop.permute.xlu0 %472 }
  0x91   : > { %v531_v16 = vmul.f32 %v1862_v10, %v465_v0  ;;  %v533_v29 = vmul.f32 %v1862_v10, %v473_v1 }
  0x94   : > { %v469_v3 = vpop.permute.xlu1 %468  ;;  %v489_v4 = vpop.permute.xlu0 %488 }
  0x95   : > { %v532_v23 = vmul.f32 %v1862_v10, %v469_v3  ;;  %v537_v50 = vmul.f32 %v1862_v10, %v489_v4 }
  0x98   : > { %v1857_v6 = vpop.permute.xlu0 %504 }
  0x99   : > { %v359_v9 = vpop.permute.xlu1 %358 }
  0x9a   : > { %v428_v21 = vmul.f32 %v1864_v11, %v359_v9 }
  0x9c   : > { %v450_v32 = vadd.f32 %v1870_v15, %v428_v21 }
  0x9d   : > { %v344_v12 = vpop.permute.xlu0 %343 }
  0x9e   : > { %v425_v13 = vmul.f32 %v1864_v11, %v344_v12  ;;  %v477_v14 = vpop.permute.xlu1 %476 }
  0x9f   : > { %v534_v26 = vmul.f32 %v1862_v10, %v477_v14 }
  0xa0   : > { %v447_v17 = vadd.f32 %v1870_v15, %v425_v13 }
  0xa1   : > { %v349_v18 = vpop.permute.xlu0 %348  ;;  %v550_v36 = vadd.f32 %v534_v26, %v450_v32 }
  0xa2   : > { %v426_v19 = vmul.f32 %v1864_v11, %v349_v18  ;;  %v547_v20 = vadd.f32 %v531_v16, %v447_v17  ;;  %v541_v16 = vmul.f32 %v1862_v10, %v1857_v6 }
  0xa3   : > { %v364_v22 = vpop.permute.xlu1 %363  ;;  %v566_v46 = vmax.f32 %v550_v36, 0.0 }
  0xa4   : > { %v448_v24 = vadd.f32 %v1870_v15, %v426_v19  ;;  %v563_v25 = vmax.f32 %v547_v20, 0.0  ;;  %v429_v27 = vmul.f32 %v1864_v11, %v364_v22 }
  0xa5   : > { %v354_v28 = vpop.permute.xlu0 %353 }
  0xa6   : > { %v427_v30 = vmul.f32 %v1864_v11, %v354_v28  ;;  %1489 = vmatprep.mubr.f32.mxu0 %v563_v25  ;;  %v548_v31 = vadd.f32 %v532_v23, %v448_v24  ;;  %v451_v37 = vadd.f32 %v1870_v15, %v429_v27 }
  0xa8   : > { %v449_v33 = vadd.f32 %v1870_v15, %v427_v30  ;;  %v481_v34 = vpop.permute.xlu1 %480  ;;  %v564_v35 = vmax.f32 %v548_v31, 0.0 }
  0xa9   : > { %v535_v38 = vmul.f32 %v1862_v10, %v481_v34  ;;  %v369_v39 = vpop.permute.xlu0 %368 }
  0xaa   : > { %v430_v40 = vmul.f32 %v1864_v11, %v369_v39  ;;  %1490 = vmatmul.mubr.f32.vlgmr.msra.gmra.mrb[0].mxu0 %v564_v35  ;;  %v549_v41 = vadd.f32 %v533_v29, %v449_v33 }
  0xab   : > { %v551_v42 = vadd.f32 %v535_v38, %v451_v37 }
  0xac   : > { %v452_v43 = vadd.f32 %v1870_v15, %v430_v40  ;;  %v485_v44 = vpop.permute.xlu1 %484  ;;  %v565_v45 = vmax.f32 %v549_v41, 0.0 }
  0xad   : > { %v567_v47 = vmax.f32 %v551_v42, 0.0  ;;  %v536_v48 = vmul.f32 %v1862_v10, %v485_v44  ;;  %v374_v49 = vpop.permute.xlu0 %373 }
  0xae   : > { %v431_v51 = vmul.f32 %v1864_v11, %v374_v49  ;;  %1492 = vmatprep.mubr.f32.mxu0 %v565_v45 }
  0xaf   : > { %v552_v52 = vadd.f32 %v536_v48, %v452_v43  ;;  %1493 = vmatmul.mubr.f32.gmra.mrb[2].mxu0 %v566_v46 }
  0xb0   : > { %v453_v53 = vadd.f32 %v1870_v15, %v431_v51  ;;  %1495 = vmatprep.mubr.f32.mxu0 %v567_v47 }
  0xb1   : > { %v568_v54 = vmax.f32 %v552_v52, 0.0  ;;  %v379_v55 = vpop.permute.xlu1 %378  ;;  %v389_v59 = vpop.permute.xlu0 %388 }
  0xb2   : > { %v553_v56 = vadd.f32 %v537_v50, %v453_v53  ;;  %v432_v57 = vmul.f32 %v1864_v11, %v379_v55  ;;  %v434_v8 = vmul.f32 %v1864_v11, %v389_v59  ;;  %v777_v59 = vld [vmem:[%s2357_s5 + $0x70] sm:$0xff] }
  0xb3   : > { %1496 = vmatmul.mubr.f32.gmra.mrb[4].mxu0 %v568_v54 }
  0xb4   : > { %v569_v58 = vmax.f32 %v553_v56, 0.0  ;;  %v454_v61 = vadd.f32 %v1870_v15, %v432_v57  ;;  %v456_v18 = vadd.f32 %v1870_v15, %v434_v8 }
  0xb5   : > { %v394_v1 = vpop.permute.xlu0 %393 }
  0xb6   : > { %v493_v60 = vpop.permute.xlu1 %492  ;;  %1498 = vmatprep.mubr.f32.mxu0 %v569_v58  ;;  %v435_v5 = vmul.f32 %v1864_v11, %v394_v1 }
  0xb7   : > { %v538_v62 = vmul.f32 %v1862_v10, %v493_v60  ;;  %v778_v60 = vld [vmem:[%s2357_s5 + $0x78] sm:$0xff] }
  0xb8   : > { %v457_v13 = vadd.f32 %v1870_v15, %v435_v5 }
  0xb9   : > { %v554_v0 = vadd.f32 %v538_v62, %v454_v61  ;;  %v409_v26 = vpop.permute.xlu0 %408  ;;  %v1629_v61 = vpack.c.bf16 %v778_v60, %v777_v59 }
  0xba   : > { %v557_v21 = vadd.f32 %v541_v16, %v457_v13  ;;  %v438_v38 = vmul.f32 %v1864_v11, %v409_v26 }
  0xbb   : > { %v570_v2 = vmax.f32 %v554_v0, 0.0  ;;  %v384_v3 = vpop.permute.xlu1 %383  ;;  %1630 = vmatprep.subr.bf16.mxu1 %v1629_v61 }
  0xbc   : > { %v433_v4 = vmul.f32 %v1864_v11, %v384_v3  ;;  %v573_v25 = vmax.f32 %v557_v21, 0.0  ;;  %v460_v45 = vadd.f32 %v1870_v15, %v438_v38  ;;  %1632 = vmatpush3.bf16.msra.mxu1 %v1629_v61 }
  0xbd   : > { %1499 = vmatmul.mubr.f32.gmra.mrb[6].mxu0 %v570_v2  ;;  %v414_v30 = vpop.permute.xlu0 %413 }
  0xbe   : > { %v455_v9 = vadd.f32 %v1870_v15, %v433_v4  ;;  %v439_v35 = vmul.f32 %v1864_v11, %v414_v30 }
  0xc0   : > { %v497_v7 = vpop.permute.xlu1 %496  ;;  %v461_v41 = vadd.f32 %v1870_v15, %v439_v35 }
  0xc1   : > { %v539_v12 = vmul.f32 %v1862_v10, %v497_v7 }
  0xc2   : > { %v521_v36 = vpop.permute.xlu0 %520 }
  0xc3   : > { %v555_v14 = vadd.f32 %v539_v12, %v455_v9  ;;  %v545_v42 = vmul.f32 %v1862_v10, %v521_v36 }
  0xc4   : > { %v501_v17 = vpop.permute.xlu1 %500 }
  0xc5   : > { %v571_v19 = vmax.f32 %v555_v14, 0.0  ;;  %v540_v20 = vmul.f32 %v1862_v10, %v501_v17  ;;  %v561_v48 = vadd.f32 %v545_v42, %v461_v41 }
  0xc7   : > { %v556_v22 = vadd.f32 %v540_v20, %v456_v18  ;;  %1501 = vmatprep.mubr.f32.mxu0 %v571_v19  ;;  %v577_v52 = vmax.f32 %v561_v48, 0.0  ;;  %v1932_v48 = vld [vmem:[%s2358_s6] ss:$0 sm:$0xff] }
  0xc9   : > { %v572_v23 = vmax.f32 %v556_v22, 0.0  ;;  %v399_v24 = vpop.permute.xlu1 %398 }
  0xca   : > { %v436_v27 = vmul.f32 %v1864_v11, %v399_v24 }
  0xcb   : > { %1502 = vmatmul.mubr.f32.gmra.mrb[8].mxu0 %v572_v23 }
  0xcc   : > { %1504 = vmatprep.mubr.f32.mxu0 %v573_v25  ;;  %v458_v6 = vadd.f32 %v1870_v15, %v436_v27 }
  0xce   : > { %v509_v28 = vpop.permute.xlu1 %508 }
  0xcf   : > { %v542_v29 = vmul.f32 %v1862_v10, %v509_v28 }
  0xd1   : > { %v558_v31 = vadd.f32 %v542_v29, %v458_v6 }
  0xd3   : > { %v574_v32 = vmax.f32 %v558_v31, 0.0  ;;  %v404_v33 = vpop.permute.xlu1 %403 }
  0xd4   : > { %v437_v34 = vmul.f32 %v1864_v11, %v404_v33 }
  0xd5   : > { %1505 = vmatmul.mubr.f32.gmra.mrb[10].mxu0 %v574_v32 }
  0xd6   : > { %v459_v39 = vadd.f32 %v1870_v15, %v437_v34 }
  0xd8   : > { %v513_v37 = vpop.permute.xlu1 %512 }
  0xd9   : > { %v543_v40 = vmul.f32 %v1862_v10, %v513_v37 }
  0xdb   : > { %v559_v43 = vadd.f32 %v543_v40, %v459_v39 }
  0xdc   : > { %v517_v44 = vpop.permute.xlu1 %516 }
  0xdd   : > { %v575_v46 = vmax.f32 %v559_v43, 0.0  ;;  %v544_v47 = vmul.f32 %v1862_v10, %v517_v44 }
  0xdf   : > { %v560_v49 = vadd.f32 %v544_v47, %v460_v45  ;;  %1507 = vmatprep.mubr.f32.mxu0 %v575_v46 }
  0xe1   : > { %v576_v50 = vmax.f32 %v560_v49, 0.0  ;;  %v419_v51 = vpop.permute.xlu1 %418 }
  0xe2   : > { %v440_v53 = vmul.f32 %v1864_v11, %v419_v51  ;;  %v1389_v11 = vld [vmem:[%s2356_s4] ss:$0 sm:$0xff] }
  0xe3   : > { %1508 = vmatmul.mubr.f32.gmra.mrb[12].mxu0 %v576_v50 }
  0xe4   : > { %1510 = vmatprep.mubr.f32.mxu0 %v577_v52  ;;  %v462_v55 = vadd.f32 %v1870_v15, %v440_v53 }
  0xe6   : > { %v525_v54 = vpop.permute.xlu1 %524 }
  0xe7   : > { %v546_v56 = vmul.f32 %v1862_v10, %v525_v54 }
  0xe9   : > { %v562_v57 = vadd.f32 %v546_v56, %v462_v55 }
  0xeb   : > { %v578_v58 = vmax.f32 %v562_v57, 0.0 }
  0xed   : > { %1511 = vmatmul.mubr.f32.gmra.mrb[14].mxu0 %v578_v58 }
 0x17d   : > { %v1491_v15 = vpop.f32.mrb[0].mxu0 }
 0x17e   : > { %v674_v10 = vadd.f32 %v1491_v15, %v1389_v11  ;;  %v668_v62 = vpop.f32.mrb[1].mxu0 }
 0x17f   : > { %v669_v0 = vadd.f32 %v1389_v11, %v668_v62 }
 0x180   : > { %v748_v2 = vmax.f32 %v674_v10, 0.0 }
 0x181   : > { %v747_v1 = vmax.f32 %v669_v0, 0.0 }
 0x182   : > { %v1494_v3 = vpop.f32.mrb[2].mxu0 }
 0x183   : > { %v684_v4 = vadd.f32 %v1494_v3, %v1389_v11  ;;  %v678_v5 = vpop.f32.mrb[3].mxu0  ;;  %1545 = vmatprep.mubr.f32.mxu1 %v747_v1 }
 0x184   : > { %v679_v7 = vadd.f32 %v1389_v11, %v678_v5  ;;  %1546 = vmatmul.mubr.f32.vlgmr.msra.gmra.mrb[0].mxu1 %v748_v2 }
 0x185   : > { %v750_v12 = vmax.f32 %v684_v4, 0.0 }
 0x186   : > { %v749_v8 = vmax.f32 %v679_v7, 0.0  ;;  %v1497_v9 = vpop.f32.mrb[4].mxu0 }
 0x187   : > { %v694_v13 = vadd.f32 %v1497_v9, %v1389_v11  ;;  %v688_v14 = vpop.f32.mrb[5].mxu0 }
 0x188   : > { %v689_v16 = vadd.f32 %v1389_v11, %v688_v14  ;;  %1548 = vmatprep.mubr.f32.mxu1 %v749_v8 }
 0x189   : > { %1549 = vmatmul.mubr.f32.gmra.mrb[2].mxu1 %v750_v12  ;;  %v752_v18 = vmax.f32 %v694_v13, 0.0 }
 0x18a   : > { %v751_v17 = vmax.f32 %v689_v16, 0.0 }
 0x18c   : > { %1551 = vmatprep.mubr.f32.mxu1 %v751_v17 }
 0x18d   : > { %1552 = vmatmul.mubr.f32.gmra.mrb[4].mxu1 %v752_v18 }
 0x190   : > { %v1500_v19 = vpop.f32.mrb[6].mxu0 }
 0x191   : > { %v704_v20 = vadd.f32 %v1500_v19, %v1389_v11  ;;  %v698_v21 = vpop.f32.mrb[7].mxu0 }
 0x192   : > { %v699_v22 = vadd.f32 %v1389_v11, %v698_v21 }
 0x193   : > { %v754_v24 = vmax.f32 %v704_v20, 0.0 }
 0x194   : > { %v753_v23 = vmax.f32 %v699_v22, 0.0 }
 0x196   : > { %1554 = vmatprep.mubr.f32.mxu1 %v753_v23 }
 0x197   : > { %1555 = vmatmul.mubr.f32.gmra.mrb[6].mxu1 %v754_v24 }
 0x19e   : > { %v1503_v25 = vpop.f32.mrb[8].mxu0 }
 0x19f   : > { %v714_v26 = vadd.f32 %v1503_v25, %v1389_v11  ;;  %v708_v27 = vpop.f32.mrb[9].mxu0 }
 0x1a0   : > { %v709_v28 = vadd.f32 %v1389_v11, %v708_v27 }
 0x1a1   : > { %v756_v29 = vmax.f32 %v714_v26, 0.0 }
 0x1a2   : > { %v755_v6 = vmax.f32 %v709_v28, 0.0 }
 0x1a4   : > { %1557 = vmatprep.mubr.f32.mxu1 %v755_v6 }
 0x1a5   : > { %1558 = vmatmul.mubr.f32.gmra.mrb[8].mxu1 %v756_v29 }
 0x1a8   : > { %v1506_v30 = vpop.f32.mrb[10].mxu0 }
 0x1a9   : > { %v724_v31 = vadd.f32 %v1506_v30, %v1389_v11  ;;  %v718_v32 = vpop.f32.mrb[11].mxu0 }
 0x1aa   : > { %v719_v33 = vadd.f32 %v1389_v11, %v718_v32 }
 0x1ab   : > { %v758_v35 = vmax.f32 %v724_v31, 0.0 }
 0x1ac   : > { %v757_v34 = vmax.f32 %v719_v33, 0.0 }
 0x1ae   : > { %1560 = vmatprep.mubr.f32.mxu1 %v757_v34  ;;  %v2069_v34 = vand.u32 127, %v421_v63 }
 0x1af   : > { %1561 = vmatmul.mubr.f32.gmra.mrb[10].mxu1 %v758_v35 }
 0x1b6   : > { %v1509_v36 = vpop.f32.mrb[12].mxu0 }
 0x1b7   : > { %v734_v37 = vadd.f32 %v1509_v36, %v1389_v11  ;;  %v728_v38 = vpop.f32.mrb[13].mxu0 }
 0x1b8   : > { %v729_v39 = vadd.f32 %v1389_v11, %v728_v38 }
 0x1b9   : > { %v760_v41 = vmax.f32 %v734_v37, 0.0 }
 0x1ba   : > { %v759_v40 = vmax.f32 %v729_v39, 0.0 }
 0x1bc   : > { %1563 = vmatprep.mubr.f32.mxu1 %v759_v40 }
 0x1bd   : > { %1564 = vmatmul.mubr.f32.gmra.mrb[12].mxu1 %v760_v41 }
 0x1c0   : > { %v1512_v42 = vpop.f32.mrb[14].mxu0 }
 0x1c1   : > { %v744_v43 = vadd.f32 %v1512_v42, %v1389_v11  ;;  %v738_v44 = vpop.f32.mrb[15].mxu0 }
 0x1c2   : > { %v739_v45 = vadd.f32 %v1389_v11, %v738_v44 }
 0x1c3   : > { %v762_v47 = vmax.f32 %v744_v43, 0.0 }
 0x1c4   : > { %v761_v46 = vmax.f32 %v739_v45, 0.0 }
 0x1c6   : > { %1566 = vmatprep.mubr.f32.mxu1 %v761_v46 }
 0x1c7   : > { %1567 = vmatmul.mubr.f32.gmra.mrb[14].mxu1 %v762_v47 }
 0x257   : > { %v1547_v49 = vpop.f32.mrb[0].mxu1 }
 0x258   : > { %v1941_v50 = vadd.f32 %v1547_v49, %v1932_v48  ;;  %v852_v51 = vpop.f32.mrb[1].mxu1 }
 0x259   : > { %v1944_v52 = vadd.f32 %v1932_v48, %v852_v51 }
 0x25a   : > { %933 = vst.msk [vmem:[%s1938_s28 + $0x8] sm:$0xff] %vm931_vm0, %v1941_v50  ;;  %v953_v53 = vsel %vm931_vm0, %v1941_v50, -inf }
 0x25b   : > { %932 = vst.msk [vmem:[%s1938_s28] sm:$0xff] %vm931_vm0, %v1944_v52  ;;  %954 = vmax.xlane.f32.xlu0 %v953_v53  ;;  %v950_v54 = vsel %vm931_vm0, %v1944_v52, -inf }
 0x25c   : > { %951 = vmax.xlane.f32.xlu1 %v950_v54  ;;  %v1550_v55 = vpop.f32.mrb[2].mxu1 }
 0x25d   : > { %v1957_v56 = vadd.f32 %v1550_v55, %v1932_v48  ;;  %v862_v57 = vpop.f32.mrb[3].mxu1 }
 0x25e   : > { %v1960_v58 = vadd.f32 %v1932_v48, %v862_v57 }
 0x25f   : > { %935 = vst.msk [vmem:[%s1938_s28 + $0x18] sm:$0xff] %vm931_vm0, %v1957_v56  ;;  %v959_v59 = vsel %vm931_vm0, %v1957_v56, -inf }
 0x260   : > { %934 = vst.msk [vmem:[%s1938_s28 + $0x10] sm:$0xff] %vm931_vm0, %v1960_v58  ;;  %960 = vmax.xlane.f32.xlu1 %v959_v59  ;;  %v1553_v60 = vpop.f32.mrb[4].mxu1  ;;  %v956_v61 = vsel %vm931_vm0, %v1960_v58, -inf }
 0x261   : > { %v1973_v11 = vadd.f32 %v1553_v60, %v1932_v48  ;;  %957 = vmax.xlane.f32.xlu0 %v956_v61  ;;  %v872_v15 = vpop.f32.mrb[5].mxu1 }
 0x262   : > { %v1976_v10 = vadd.f32 %v1932_v48, %v872_v15 }
 0x263   : > { %937 = vst.msk [vmem:[%s1938_s28 + $0x28] sm:$0xff] %vm931_vm0, %v1973_v11  ;;  %v965_v62 = vsel %vm931_vm0, %v1973_v11, -inf }
 0x264   : > { %936 = vst.msk [vmem:[%s1938_s28 + $0x20] sm:$0xff] %vm931_vm0, %v1976_v10  ;;  %966 = vmax.xlane.f32.xlu1 %v965_v62  ;;  %v962_v0 = vsel %vm931_vm0, %v1976_v10, -inf }
 0x265   : > { %963 = vmax.xlane.f32.xlu0 %v962_v0 }
 0x26a   : > { %v1556_v1 = vpop.f32.mrb[6].mxu1 }
 0x26b   : > { %v1989_v2 = vadd.f32 %v1556_v1, %v1932_v48  ;;  %v882_v3 = vpop.f32.mrb[7].mxu1 }
 0x26c   : > { %v1992_v4 = vadd.f32 %v1932_v48, %v882_v3 }
 0x26d   : > { %939 = vst.msk [vmem:[%s1938_s28 + $0x38] sm:$0xff] %vm931_vm0, %v1989_v2  ;;  %v971_v5 = vsel %vm931_vm0, %v1989_v2, -inf }
 0x26e   : > { %938 = vst.msk [vmem:[%s1938_s28 + $0x30] sm:$0xff] %vm931_vm0, %v1992_v4  ;;  %972 = vmax.xlane.f32.xlu1 %v971_v5  ;;  %v968_v7 = vsel %vm931_vm0, %v1992_v4, -inf }
 0x26f   : > { %969 = vmax.xlane.f32.xlu0 %v968_v7 }
 0x278   : > { %v1559_v8 = vpop.f32.mrb[8].mxu1 }
 0x279   : > { %v2005_v9 = vadd.f32 %v1559_v8, %v1932_v48  ;;  %v892_v12 = vpop.f32.mrb[9].mxu1 }
 0x27a   : > { %v2008_v13 = vadd.f32 %v1932_v48, %v892_v12 }
 0x27b   : > { %941 = vst.msk [vmem:[%s1938_s28 + $0x48] sm:$0xff] %vm931_vm0, %v2005_v9  ;;  %v977_v14 = vsel %vm931_vm0, %v2005_v9, -inf }
 0x27c   : > { %940 = vst.msk [vmem:[%s1938_s28 + $0x40] sm:$0xff] %vm931_vm0, %v2008_v13  ;;  %978 = vmax.xlane.f32.xlu1 %v977_v14  ;;  %v974_v16 = vsel %vm931_vm0, %v2008_v13, -inf }
 0x27d   : > { %975 = vmax.xlane.f32.xlu0 %v974_v16 }
 0x282   : > { %v1562_v17 = vpop.f32.mrb[10].mxu1 }
 0x283   : > { %v2021_v18 = vadd.f32 %v1562_v17, %v1932_v48  ;;  %v902_v19 = vpop.f32.mrb[11].mxu1 }
 0x284   : > { %v2024_v20 = vadd.f32 %v1932_v48, %v902_v19 }
 0x285   : > { %943 = vst.msk [vmem:[%s1938_s28 + $0x58] sm:$0xff] %vm931_vm0, %v2021_v18  ;;  %v983_v21 = vsel %vm931_vm0, %v2021_v18, -inf }
 0x286   : > { %942 = vst.msk [vmem:[%s1938_s28 + $0x50] sm:$0xff] %vm931_vm0, %v2024_v20  ;;  %984 = vmax.xlane.f32.xlu1 %v983_v21  ;;  %v980_v22 = vsel %vm931_vm0, %v2024_v20, -inf }
 0x287   : > { %981 = vmax.xlane.f32.xlu0 %v980_v22 }
 0x290   : > { %v1565_v23 = vpop.f32.mrb[12].mxu1 }
 0x291   : > { %v2037_v24 = vadd.f32 %v1565_v23, %v1932_v48  ;;  %v912_v25 = vpop.f32.mrb[13].mxu1 }
 0x292   : > { %v2040_v26 = vadd.f32 %v1932_v48, %v912_v25 }
 0x293   : > { %945 = vst.msk [vmem:[%s1938_s28 + $0x68] sm:$0xff] %vm931_vm0, %v2037_v24  ;;  %v989_v27 = vsel %vm931_vm0, %v2037_v24, -inf }
 0x294   : > { %944 = vst.msk [vmem:[%s1938_s28 + $0x60] sm:$0xff] %vm931_vm0, %v2040_v26  ;;  %990 = vmax.xlane.f32.xlu1 %v989_v27  ;;  %v986_v28 = vsel %vm931_vm0, %v2040_v26, -inf }
 0x295   : > { %987 = vmax.xlane.f32.xlu0 %v986_v28 }
 0x29a   : > { %v1568_v6 = vpop.f32.mrb[14].mxu1 }
 0x29b   : > { %v2053_v29 = vadd.f32 %v1568_v6, %v1932_v48  ;;  %v922_v30 = vpop.f32.mrb[15].mxu1 }
 0x29c   : > { %v2056_v31 = vadd.f32 %v1932_v48, %v922_v30 }
 0x29d   : > { %947 = vst.msk [vmem:[%s1938_s28 + $0x78] sm:$0xff] %vm931_vm0, %v2053_v29  ;;  %v995_v32 = vsel %vm931_vm0, %v2053_v29, -inf }
 0x29e   : > { %946 = vst.msk [vmem:[%s1938_s28 + $0x70] sm:$0xff] %vm931_vm0, %v2056_v31  ;;  %996 = vmax.xlane.f32.xlu1 %v995_v32  ;;  %v992_v33 = vsel %vm931_vm0, %v2056_v31, -inf }
 0x29f   : > { %993 = vmax.xlane.f32.xlu0 %v992_v33 }
 0x2e8   : > { %v955_v35 = vpop.xlane.xlu0 %954 }
 0x2e9   : > { %vm999_vm1 = vcmp.eq.f32.partialorder %v1941_v50, %v955_v35  ;;  %v952_v36 = vpop.xlane.xlu1 %951 }
 0x2ea   : > { %v1015_v37 = vsel %vm999_vm1, %v2069_v34, 3  ;;  %vm998_vm2 = vcmp.eq.f32.partialorder %v1944_v52, %v952_v36 }
 0x2eb   : > { %v2075_v38 = vsel %vm931_vm0, %v1015_v37, 2147483647  ;;  %v1014_v39 = vsel %vm998_vm2, %v2069_v34, 3 }
 0x2ec   : > { %v2079_v40 = vsel %vm931_vm0, %v1014_v39, 2147483647  ;;  %v1047_v41 = vshra.s32 %v2075_v38, 16 }
 0x2ed   : > { %v961_v63 = vpop.xlane.xlu1 %960  ;;  %v1032_v42 = vshra.s32 %v2079_v40, 16 }
 0x2ee   : > { %vm1001_vm3 = vcmp.eq.f32.partialorder %v1957_v56, %v961_v63  ;;  %v958_v43 = vpop.xlane.xlu0 %957  ;;  %v2084_v44 = vcvt.s32.f32 %v1047_v41 }
 0x2ef   : > { %v1017_v45 = vsel %vm1001_vm3, %v2069_v34, 3  ;;  %vm1000_vm4 = vcmp.eq.f32.partialorder %v1960_v58, %v958_v43  ;;  %v2088_v46 = vcvt.s32.f32 %v1032_v42 }
 0x2f0   : > { %v2091_v47 = vsel %vm931_vm0, %v1017_v45, 2147483647  ;;  %v1016_v48 = vsel %vm1000_vm4, %v2069_v34, 3  ;;  %1050 = vmin.xlane.f32.xlu1 %v2084_v44 }
 0x2f1   : > { %v2096_v49 = vsel %vm931_vm0, %v1016_v48, 2147483647  ;;  %1035 = vmin.xlane.f32.xlu0 %v2088_v46  ;;  %v967_v50 = vpop.xlane.xlu1 %966  ;;  %v1077_v51 = vshra.s32 %v2091_v47, 16 }
 0x2f2   : > { %vm1003_vm5 = vcmp.eq.f32.partialorder %v1973_v11, %v967_v50  ;;  %v964_v52 = vpop.xlane.xlu0 %963  ;;  %v1062_v53 = vshra.s32 %v2096_v49, 16 }
 0x2f3   : > { %v1019_v54 = vsel %vm1003_vm5, %v2069_v34, 3  ;;  %vm1002_vm6 = vcmp.eq.f32.partialorder %v1976_v10, %v964_v52  ;;  %v2104_v55 = vcvt.s32.f32 %v1077_v51 }
 0x2f4   : > { %v2107_v56 = vsel %vm931_vm0, %v1019_v54, 2147483647  ;;  %v1018_v57 = vsel %vm1002_vm6, %v2069_v34, 3  ;;  %v2110_v58 = vcvt.s32.f32 %v1062_v53 }
 0x2f5   : > { %v2113_v59 = vsel %vm931_vm0, %v1018_v57, 2147483647  ;;  %1080 = vmin.xlane.f32.xlu1 %v2104_v55  ;;  %v1107_v60 = vshra.s32 %v2107_v56, 16 }
 0x2f6   : > { %1065 = vmin.xlane.f32.xlu0 %v2110_v58  ;;  %v1092_v61 = vshra.s32 %v2113_v59, 16 }
 0x2f7   : > { %v2119_v11 = vcvt.s32.f32 %v1107_v60 }
 0x2f8   : > { %v2121_v15 = vcvt.s32.f32 %v1092_v61 }
 0x2f9   : > { %1110 = vmin.xlane.f32.xlu1 %v2119_v11 }
 0x2fa   : > { %1095 = vmin.xlane.f32.xlu0 %v2121_v15 }
 0x2fb   : > { %v973_v10 = vpop.xlane.xlu1 %972 }
 0x2fc   : > { %vm1005_vm7 = vcmp.eq.f32.partialorder %v1989_v2, %v973_v10  ;;  %v970_v62 = vpop.xlane.xlu0 %969  ;;  %v1031_v10 = vand.u32 65535, %v2079_v40 }
 0x2fd   : > { %v1021_v0 = vsel %vm1005_vm7, %v2069_v34, 3  ;;  %vm1004_vm8 = vcmp.eq.f32.partialorder %v1992_v4, %v970_v62 }
 0x2fe   : > { %v2129_v1 = vsel %vm931_vm0, %v1021_v0, 2147483647  ;;  %v1020_v3 = vsel %vm1004_vm8, %v2069_v34, 3 }
 0x2ff   : > { %v2133_v5 = vsel %vm931_vm0, %v1020_v3, 2147483647  ;;  %v1137_v7 = vshra.s32 %v2129_v1, 16  ;;  %v1033_v3 = vcvt.s32.f32 %v1031_v10 }
 0x300   : > { %v1122_v8 = vshra.s32 %v2133_v5, 16 }
 0x301   : > { %v2137_v12 = vcvt.s32.f32 %v1137_v7  ;;  %v1076_v7 = vand.u32 65535, %v2091_v47  ;;  %v1091_v47 = vand.u32 65535, %v2113_v59 }
 0x302   : > { %v2139_v2 = vcvt.s32.f32 %v1122_v8 }
 0x303   : > { %1140 = vmin.xlane.f32.xlu1 %v2137_v12 }
 0x304   : > { %1125 = vmin.xlane.f32.xlu0 %v2139_v2 }
 0x309   : > { %v979_v4 = vpop.xlane.xlu1 %978 }
 0x30a   : > { %vm1007_vm9 = vcmp.eq.f32.partialorder %v2005_v9, %v979_v4  ;;  %v976_v14 = vpop.xlane.xlu0 %975  ;;  %v1061_v4 = vand.u32 65535, %v2096_v49 }
 0x30b   : > { %v1023_v16 = vsel %vm1007_vm9, %v2069_v34, 3  ;;  %vm1006_vm10 = vcmp.eq.f32.partialorder %v2008_v13, %v976_v14  ;;  %v1078_v14 = vcvt.s32.f32 %v1076_v7 }
 0x30c   : > { %v2147_v17 = vsel %vm931_vm0, %v1023_v16, 2147483647  ;;  %v1022_v19 = vsel %vm1006_vm10, %v2069_v34, 3  ;;  %v1106_v16 = vand.u32 65535, %v2107_v56  ;;  %v1093_v56 = vcvt.s32.f32 %v1091_v47 }
 0x30d   : > { %v2151_v21 = vsel %vm931_vm0, %v1022_v19, 2147483647  ;;  %v1167_v22 = vshra.s32 %v2147_v17, 16 }
 0x30e   : > { %v1152_v23 = vshra.s32 %v2151_v21, 16 }
 0x30f   : > { %v2155_v25 = vcvt.s32.f32 %v1167_v22 }
 0x310   : > { %v2157_v9 = vcvt.s32.f32 %v1152_v23  ;;  %v1108_v23 = vcvt.s32.f32 %v1106_v16 }
 0x311   : > { %1170 = vmin.xlane.f32.xlu1 %v2155_v25 }
 0x312   : > { %1155 = vmin.xlane.f32.xlu0 %v2157_v9 }
 0x313   : > { %v985_v13 = vpop.xlane.xlu1 %984 }
 0x314   : > { %vm1009_vm11 = vcmp.eq.f32.partialorder %v2021_v18, %v985_v13  ;;  %v982_v27 = vpop.xlane.xlu0 %981 }
 0x315   : > { %v1025_v28 = vsel %vm1009_vm11, %v2069_v34, 3  ;;  %vm1008_vm12 = vcmp.eq.f32.partialorder %v2024_v20, %v982_v27  ;;  %v1121_v27 = vand.u32 65535, %v2133_v5  ;;  %v1151_v5 = vand.u32 65535, %v2151_v21 }
 0x316   : > { %v2165_v6 = vsel %vm931_vm0, %v1025_v28, 2147483647  ;;  %v1024_v30 = vsel %vm1008_vm12, %v2069_v34, 3 }
 0x317   : > { %v2169_v32 = vsel %vm931_vm0, %v1024_v30, 2147483647  ;;  %v1197_v33 = vshra.s32 %v2165_v6, 16 }
 0x318   : > { %v1182_v35 = vshra.s32 %v2169_v32, 16  ;;  %v1181_v21 = vand.u32 65535, %v2169_v32 }
 0x319   : > { %v2173_v36 = vcvt.s32.f32 %v1197_v33 }
 0x31a   : > { %v2175_v18 = vcvt.s32.f32 %v1182_v35 }
 0x31b   : > { %1200 = vmin.xlane.f32.xlu1 %v2173_v36 }
 0x31c   : > { %1185 = vmin.xlane.f32.xlu0 %v2175_v18 }
 0x321   : > { %v991_v20 = vpop.xlane.xlu1 %990 }
 0x322   : > { %vm1011_vm13 = vcmp.eq.f32.partialorder %v2037_v24, %v991_v20  ;;  %v988_v37 = vpop.xlane.xlu0 %987 }
 0x323   : > { %v1027_v39 = vsel %vm1011_vm13, %v2069_v34, 3  ;;  %vm1010_vm14 = vcmp.eq.f32.partialorder %v2040_v26, %v988_v37 }
 0x324   : > { %v2183_v41 = vsel %vm931_vm0, %v1027_v39, 2147483647  ;;  %v1026_v63 = vsel %vm1010_vm14, %v2069_v34, 3 }
 0x325   : > { %v2187_v42 = vsel %vm931_vm0, %v1026_v63, 2147483647  ;;  %v1227_v43 = vshra.s32 %v2183_v41, 16 }
 0x326   : > { %v1212_v45 = vshra.s32 %v2187_v42, 16  ;;  %v1211_v32 = vand.u32 65535, %v2187_v42 }
 0x327   : > { %v2191_v48 = vcvt.s32.f32 %v1227_v43 }
 0x328   : > { %v2193_v24 = vcvt.s32.f32 %v1212_v45 }
 0x329   : > { %1230 = vmin.xlane.f32.xlu1 %v2191_v48 }
 0x32a   : > { %1215 = vmin.xlane.f32.xlu0 %v2193_v24 }
 0x32b   : > { %v997_v26 = vpop.xlane.xlu1 %996 }
 0x32c   : > { %vm1013_vm15 = vcmp.eq.f32.partialorder %v2053_v29, %v997_v26  ;;  %v994_v50 = vpop.xlane.xlu0 %993 }
 0x32d   : > { %v1029_v51 = vsel %vm1013_vm15, %v2069_v34, 3  ;;  %vm1012_vm1 = vcmp.eq.f32.partialorder %v2056_v31, %v994_v50  ;;  %v1046_v31 = vand.u32 65535, %v2075_v38 }
 0x32e   : > { %v2201_v52 = vsel %vm931_vm0, %v1029_v51, 2147483647  ;;  %v1028_v53 = vsel %vm1012_vm1, %v2069_v34, 3 }
 0x32f   : > { %v2205_v54 = vsel %vm931_vm0, %v1028_v53, 2147483647  ;;  %v1257_v57 = vshra.s32 %v2201_v52, 16  ;;  %v1048_v62 = vcvt.s32.f32 %v1046_v31 }
 0x330   : > { %v1242_v60 = vshra.s32 %v2205_v54, 16  ;;  %v1241_v42 = vand.u32 65535, %v2205_v54 }
 0x331   : > { %v2209_v61 = vcvt.s32.f32 %v1257_v57 }
 0x332   : > { %v2211_v29 = vcvt.s32.f32 %v1242_v60 }
 0x333   : > { %1260 = vmin.xlane.f32.xlu1 %v2209_v61 }
 0x334   : > { %1245 = vmin.xlane.f32.xlu0 %v2211_v29 }
 0x37d   : > { %v2217_v34 = vpop.xlane.xlu1 %1050 }
 0x37e   : > { %v2219_v0 = vpop.xlane.xlu0 %1035  ;;  %vm1052_vm0 = vcmp.eq.f32.partialorder %v2084_v44, %v2217_v34  ;;  %v1063_v44 = vcvt.s32.f32 %v1061_v4 }
 0x37f   : > { %v1053_v8 = vsel %vm1052_vm0, %v1048_v62, inf  ;;  %vm1037_vm2 = vcmp.eq.f32.partialorder %v2088_v46, %v2219_v0  ;;  %v1042_v54 = vcvt.f32.s32 %v2219_v0  ;;  %vm1270_vm0 = vcmask 7168  }
 0x380   : > { %1054 = vmin.xlane.f32.xlu1 %v1053_v8  ;;  %v1038_v38 = vsel %vm1037_vm2, %v1033_v3, inf }
 0x381   : > { %1039 = vmin.xlane.f32.xlu0 %v1038_v38 }
 0x382   : > { %v2227_v40 = vpop.xlane.xlu1 %1080 }
 0x383   : > { %v2230_v19 = vpop.xlane.xlu0 %1065  ;;  %vm1082_vm3 = vcmp.eq.f32.partialorder %v2104_v55, %v2227_v40 }
 0x384   : > { %v1083_v22 = vsel %vm1082_vm3, %v1078_v14, inf  ;;  %vm1067_vm4 = vcmp.eq.f32.partialorder %v2110_v58, %v2230_v19  ;;  %v1136_v58 = vand.u32 65535, %v2129_v1  ;;  %v1166_v1 = vand.u32 65535, %v2147_v17 }
 0x385   : > { %1084 = vmin.xlane.f32.xlu1 %v1083_v22  ;;  %v1068_v46 = vsel %vm1067_vm4, %v1063_v44, inf  ;;  %v1196_v17 = vand.u32 65535, %v2165_v6  ;;  %v1226_v6 = vand.u32 65535, %v2183_v41  ;;  %v1256_v41 = vand.u32 65535, %v2201_v52 }
 0x386   : > { %1069 = vmin.xlane.f32.xlu0 %v1068_v46  ;;  %v2237_v49 = vpop.xlane.xlu1 %1110  ;;  %v1138_v30 = vcvt.s32.f32 %v1136_v58  ;;  %v1168_v37 = vcvt.s32.f32 %v1166_v1  ;;  %v1057_v52 = vcvt.f32.s32 %v2217_v34  ;;  %v1072_v34 = vcvt.f32.s32 %v2230_v19 }
 0x387   : > { %v2239_v13 = vpop.xlane.xlu0 %1095  ;;  %vm1112_vm5 = vcmp.eq.f32.partialorder %v2119_v11, %v2237_v49  ;;  %v1123_v11 = vcvt.s32.f32 %v1121_v27  ;;  %v1198_v45 = vcvt.s32.f32 %v1196_v17  ;;  %v1228_v53 = vcvt.s32.f32 %v1226_v6 }
 0x388   : > { %v1113_v55 = vsel %vm1112_vm5, %v1108_v23, inf  ;;  %vm1097_vm6 = vcmp.eq.f32.partialorder %v2121_v15, %v2239_v13  ;;  %v1258_v10 = vcvt.s32.f32 %v1256_v41  ;;  %v1058_v8 = vshll.u32 %v1057_v52, 16 }
 0x389   : > { %1114 = vmin.xlane.f32.xlu1 %v1113_v55  ;;  %v1098_v59 = vsel %vm1097_vm6, %v1093_v56, inf  ;;  %v1117_v22 = vcvt.f32.s32 %v2237_v49  ;;  %v1102_v56 = vcvt.f32.s32 %v2239_v13 }
 0x38a   : > { %1099 = vmin.xlane.f32.xlu0 %v1098_v59 }
 0x38b   : > { %v1118_v27 = vshll.u32 %v1117_v22, 16 }
 0x390   : > { %v2247_v28 = vpop.xlane.xlu1 %1140 }
 0x391   : > { %v2249_v33 = vpop.xlane.xlu0 %1125  ;;  %vm1142_vm7 = vcmp.eq.f32.partialorder %v2137_v12, %v2247_v28  ;;  %v1153_v12 = vcvt.s32.f32 %v1151_v5  ;;  %v1147_v13 = vcvt.f32.s32 %v2247_v28 }
 0x392   : > { %v1143_v35 = vsel %vm1142_vm7, %v1138_v30, inf  ;;  %vm1127_vm8 = vcmp.eq.f32.partialorder %v2139_v2, %v2249_v33  ;;  %v1132_v5 = vcvt.f32.s32 %v2249_v33 }
 0x393   : > { %1144 = vmin.xlane.f32.xlu1 %v1143_v35  ;;  %v1128_v15 = vsel %vm1127_vm8, %v1123_v11, inf  ;;  %v1103_v35 = vshll.u32 %v1102_v56, 16 }
 0x394   : > { %1129 = vmin.xlane.f32.xlu0 %v1128_v15  ;;  %v1133_v17 = vshll.u32 %v1132_v5, 16 }
 0x39e   : > { %v2257_v20 = vpop.xlane.xlu1 %1170 }
 0x39f   : > { %v2259_v39 = vpop.xlane.xlu0 %1155  ;;  %vm1172_vm9 = vcmp.eq.f32.partialorder %v2155_v25, %v2257_v20  ;;  %v1183_v25 = vcvt.s32.f32 %v1181_v21 }
 0x3a0   : > { %v1173_v63 = vsel %vm1172_vm9, %v1168_v37, inf  ;;  %vm1157_vm10 = vcmp.eq.f32.partialorder %v2157_v9, %v2259_v39  ;;  %v1162_v28 = vcvt.f32.s32 %v2259_v39 }
 0x3a1   : > { %1174 = vmin.xlane.f32.xlu1 %v1173_v63  ;;  %v1158_v2 = vsel %vm1157_vm10, %v1153_v12, inf  ;;  %v1148_v12 = vshll.u32 %v1147_v13, 16 }
 0x3a2   : > { %1159 = vmin.xlane.f32.xlu0 %v1158_v2 }
 0x3a8   : > { %v2267_v43 = vpop.xlane.xlu1 %1200 }
 0x3a9   : > { %v2269_v26 = vpop.xlane.xlu0 %1185  ;;  %vm1202_vm11 = vcmp.eq.f32.partialorder %v2173_v36, %v2267_v43  ;;  %v1213_v36 = vcvt.s32.f32 %v1211_v32  ;;  %v1207_v41 = vcvt.f32.s32 %v2267_v43 }
 0x3aa   : > { %v1203_v50 = vsel %vm1202_vm11, %v1198_v45, inf  ;;  %vm1187_vm12 = vcmp.eq.f32.partialorder %v2175_v18, %v2269_v26 }
 0x3ab   : > { %1204 = vmin.xlane.f32.xlu1 %v1203_v50  ;;  %v1188_v9 = vsel %vm1187_vm12, %v1183_v25, inf  ;;  %v1177_v50 = vcvt.f32.s32 %v2257_v20  ;;  %v1192_v20 = vcvt.f32.s32 %v2269_v26  ;;  %v1208_v39 = vshll.u32 %v1207_v41, 16 }
 0x3ac   : > { %1189 = vmin.xlane.f32.xlu0 %v1188_v9 }
 0x3ad   : > { %v1178_v33 = vshll.u32 %v1177_v50, 16 }
 0x3b6   : > { %v2277_v51 = vpop.xlane.xlu1 %1230 }
 0x3b7   : > { %v2279_v57 = vpop.xlane.xlu0 %1215  ;;  %vm1232_vm13 = vcmp.eq.f32.partialorder %v2191_v48, %v2277_v51  ;;  %v1243_v48 = vcvt.s32.f32 %v1241_v42 }
 0x3b8   : > { %v1233_v60 = vsel %vm1232_vm13, %v1228_v53, inf  ;;  %vm1217_vm14 = vcmp.eq.f32.partialorder %v2193_v24, %v2279_v57  ;;  %v1163_v53 = vshll.u32 %v1162_v28, 16  ;;  %v1222_v43 = vcvt.f32.s32 %v2279_v57 }
 0x3b9   : > { %1234 = vmin.xlane.f32.xlu1 %v1233_v60  ;;  %v1218_v18 = vsel %vm1217_vm14, %v1213_v36, inf }
 0x3ba   : > { %1219 = vmin.xlane.f32.xlu0 %v1218_v18 }
 0x3c0   : > { %v2287_v31 = vpop.xlane.xlu1 %1260 }
 0x3c1   : > { %v2289_v62 = vpop.xlane.xlu0 %1245  ;;  %vm1262_vm15 = vcmp.eq.f32.partialorder %v2209_v61, %v2287_v31  ;;  %v1043_v61 = vshll.u32 %v1042_v54, 16 }
 0x3c2   : > { %v1263_v3 = vsel %vm1262_vm15, %v1258_v10, inf  ;;  %vm1247_vm1 = vcmp.eq.f32.partialorder %v2211_v29, %v2289_v62  ;;  %v1087_v29 = vcvt.f32.s32 %v2227_v40  ;;  %v1073_v40 = vshll.u32 %v1072_v34, 16 }
 0x3c3   : > { %1264 = vmin.xlane.f32.xlu1 %v1263_v3  ;;  %v1248_v24 = vsel %vm1247_vm1, %v1243_v48, inf  ;;  %v1193_v3 = vshll.u32 %v1192_v20, 16 }
 0x3c4   : > { %1249 = vmin.xlane.f32.xlu0 %v1248_v24  ;;  %v1088_v47 = vshll.u32 %v1087_v29, 16 }
 0x40d   : > { %v1055_v7 = vpop.xlane.xlu1 %1054 }
 0x40e   : > { %v1056_v4 = vcvt.f32.s32 %v1055_v7  ;;  %v1040_v38 = vpop.xlane.xlu0 %1039  ;;  %v1237_v7 = vcvt.f32.s32 %v2277_v51  ;;  %v1252_v51 = vcvt.f32.s32 %v2289_v62 }
 0x40f   : > { %v1041_v14 = vcvt.f32.s32 %v1040_v38 }
 0x410   : > { %v1059_v16 = vadd.s32 %v1058_v8, %v1056_v4  ;;  %v1238_v26 = vshll.u32 %v1237_v7, 16  ;;  %v1253_v22 = vshll.u32 %v1252_v51, 16 }
 0x411   : > { %v1044_v0 = vadd.s32 %v1043_v61, %v1041_v14  ;;  %v1223_v61 = vshll.u32 %v1222_v43, 16 }
 0x412   : > { %1272 = vst.msk [vmem:[%s2301_s9 + $0x8] sm:$0xff] %vm1270_vm0, %v1059_v16  ;;  %v1085_v44 = vpop.xlane.xlu1 %1084  ;;  %v1267_v16 = vcvt.f32.s32 %v2287_v31 }
 0x413   : > { %1271 = vst.msk [vmem:[%s2301_s9] sm:$0xff] %vm1270_vm0, %v1044_v0  ;;  %v1086_v46 = vcvt.f32.s32 %v1085_v44  ;;  %v1070_v23 = vpop.xlane.xlu0 %1069 }
 0x414   : > { %v1071_v19 = vcvt.f32.s32 %v1070_v23  ;;  %v1268_v57 = vshll.u32 %v1267_v16, 16 }
 0x415   : > { %v1089_v55 = vadd.s32 %v1088_v47, %v1086_v46 }
 0x416   : > { %v1074_v59 = vadd.s32 %v1073_v40, %v1071_v19  ;;  %v1115_v58 = vpop.xlane.xlu1 %1114 }
 0x417   : > { %1274 = vst.msk [vmem:[%s2301_s9 + $0x18] sm:$0xff] %vm1270_vm0, %v1089_v55  ;;  %v1116_v30 = vcvt.f32.s32 %v1115_v58  ;;  %v1100_v11 = vpop.xlane.xlu0 %1099 }
 0x418   : > { %1273 = vst.msk [vmem:[%s2301_s9 + $0x10] sm:$0xff] %vm1270_vm0, %v1074_v59  ;;  %v1101_v49 = vcvt.f32.s32 %v1100_v11 }
 0x419   : > { %v1119_v15 = vadd.s32 %v1118_v27, %v1116_v30 }
 0x41a   : > { %v1104_v1 = vadd.s32 %v1103_v35, %v1101_v49 }
 0x41b   : > { %1276 = vst.msk [vmem:[%s2301_s9 + $0x28] sm:$0xff] %vm1270_vm0, %v1119_v15 }
 0x41c   : > { %1275 = vst.msk [vmem:[%s2301_s9 + $0x20] sm:$0xff] %vm1270_vm0, %v1104_v1 }
 0x420   : > { %v1145_v37 = vpop.xlane.xlu1 %1144 }
 0x421   : > { %v1146_v63 = vcvt.f32.s32 %v1145_v37  ;;  %v1130_v2 = vpop.xlane.xlu0 %1129 }
 0x422   : > { %v1131_v21 = vcvt.f32.s32 %v1130_v2 }
 0x423   : > { %v1149_v45 = vadd.s32 %v1148_v12, %v1146_v63 }
 0x424   : > { %v1134_v25 = vadd.s32 %v1133_v17, %v1131_v21 }
 0x425   : > { %1278 = vst.msk [vmem:[%s2301_s9 + $0x38] sm:$0xff] %vm1270_vm0, %v1149_v45 }
 0x426   : > { %1277 = vst.msk [vmem:[%s2301_s9 + $0x30] sm:$0xff] %vm1270_vm0, %v1134_v25 }
 0x42e   : > { %v1175_v9 = vpop.xlane.xlu1 %1174 }
 0x42f   : > { %v1176_v6 = vcvt.f32.s32 %v1175_v9  ;;  %v1160_v32 = vpop.xlane.xlu0 %1159 }
 0x430   : > { %v1161_v36 = vcvt.f32.s32 %v1160_v32 }
 0x431   : > { %v1179_v60 = vadd.s32 %v1178_v33, %v1176_v6 }
 0x432   : > { %v1164_v18 = vadd.s32 %v1163_v53, %v1161_v36 }
 0x433   : > { %1280 = vst.msk [vmem:[%s2301_s9 + $0x48] sm:$0xff] %vm1270_vm0, %v1179_v60 }
 0x434   : > { %1279 = vst.msk [vmem:[%s2301_s9 + $0x40] sm:$0xff] %vm1270_vm0, %v1164_v18 }
 0x438   : > { %v1205_v42 = vpop.xlane.xlu1 %1204 }
 0x439   : > { %v1206_v10 = vcvt.f32.s32 %v1205_v42  ;;  %v1190_v48 = vpop.xlane.xlu0 %1189 }
 0x43a   : > { %v1191_v24 = vcvt.f32.s32 %v1190_v48 }
 0x43b   : > { %v1209_v52 = vadd.s32 %v1208_v39, %v1206_v10 }
 0x43c   : > { %v1194_v54 = vadd.s32 %v1193_v3, %v1191_v24 }
 0x43d   : > { %1282 = vst.msk [vmem:[%s2301_s9 + $0x58] sm:$0xff] %vm1270_vm0, %v1209_v52 }
 0x43e   : > { %1281 = vst.msk [vmem:[%s2301_s9 + $0x50] sm:$0xff] %vm1270_vm0, %v1194_v54 }
 0x446   : > { %v1235_v8 = vpop.xlane.xlu1 %1234 }
 0x447   : > { %v1236_v4 = vcvt.f32.s32 %v1235_v8  ;;  %v1220_v38 = vpop.xlane.xlu0 %1219 }
 0x448   : > { %v1221_v29 = vcvt.f32.s32 %v1220_v38 }
 0x449   : > { %v1239_v14 = vadd.s32 %v1238_v26, %v1236_v4 }
 0x44a   : > { %v1224_v34 = vadd.s32 %v1223_v61, %v1221_v29 }
 0x44b   : > { %1284 = vst.msk [vmem:[%s2301_s9 + $0x68] sm:$0xff] %vm1270_vm0, %v1239_v14 }
 0x44c   : > { %1283 = vst.msk [vmem:[%s2301_s9 + $0x60] sm:$0xff] %vm1270_vm0, %v1224_v34 }
 0x450   : > { %v1265_v0 = vpop.xlane.xlu1 %1264 }
 0x451   : > { %v1266_v44 = vcvt.f32.s32 %v1265_v0  ;;  %v1250_v47 = vpop.xlane.xlu0 %1249 }
 0x452   : > { %v1251_v46 = vcvt.f32.s32 %v1250_v47 }
 0x453   : > { %v1269_v23 = vadd.s32 %v1268_v57, %v1266_v44 }
 0x454   : > { %v1254_v40 = vadd.s32 %v1253_v22, %v1251_v46 }
 0x455   : > { %1286 = vst.msk [vmem:[%s2301_s9 + $0x78] sm:$0xff] %vm1270_vm0, %v1269_v23 }
 0x456   : > { %1285 = vst.msk [vmem:[%s2301_s9 + $0x70] sm:$0xff] %vm1270_vm0, %v1254_v40 }
 0x457 PF: > { %s19_s27 = sadd.s32 1, %s1667_s27  }
 0x458   : > { %p16_p4 = scmp.ge.s32.totalorder %s19_s27, 4  }
 0x45a   :  { %18 = sbr.rel (!%p16_p4) target bundleno = 1 (0x1), region = 90 }

</bundles_post_ra>
